<compile_context>
chip_gen: v6e
topology: v6e:2x2x1
jax: 0.10.0
libtpu: 0.0.40
codegen_flags: <defaults>
</compile_context>

<pallas_src>
import jax
import jax.numpy as jnp
from jax.experimental import pallas as pl
from jax.experimental.pallas import tpu as pltpu


def conv1x1_kernel(w_ref, x_ref, o_ref):
    # w_ref: (cout_blk, Cin) bf16, x_ref: (Cin, HW) f32, o_ref: (cout_blk, HW) f32.
    # Cast the activation to bf16 in-kernel (VPU is otherwise idle here), f32 accumulate.
    o_ref[...] = jnp.dot(
        w_ref[...],
        x_ref[...].astype(jnp.bfloat16),
        preferred_element_type=jnp.float32,
    )


def prepare_conv1x1_weight(weight_oihw):
    """One-time (init / model-load) weight prep: OIHW (Cout, Cin, 1, 1) -> bf16 (Cout, Cin)."""
    cout, cin = weight_oihw.shape[0], weight_oihw.shape[1]
    return weight_oihw.reshape(cout, cin).astype(jnp.bfloat16)


def _tensorcores_per_chip() -> int:
    """Best-effort detection of TensorCores per chip (2 on v7x). Safe fallback: 1."""
    try:
        info = pltpu.get_tpu_info()
        for attr in ("num_tensorcores", "tensorcores_per_chip", "num_cores", "core_count"):
            val = getattr(info, attr, None)
            if isinstance(val, int) and val > 0:
                return val
    except Exception:
        pass
    return 1


def conv2d_1x1(x_nchw, w_bf16):
    """x_nchw: (N, Cin, H, W) f32; w_bf16: (Cout, Cin) bf16 (pre-prepared) -> (N, Cout, H, W) f32."""
    n, cin, h, w = x_nchw.shape
    cout = w_bf16.shape[0]

    # For N=1 (this module), NCHW is already (Cin, H*W) contiguous -> no transpose.
    if n == 1:
        x_mat = x_nchw.reshape(cin, h * w)
    else:
        # General-N fallback: fold batch into the spatial axis (needs one transpose).
        x_mat = jnp.moveaxis(x_nchw, 1, 0).reshape(cin, n * h * w)
    hw = x_mat.shape[1]

    # Cout split across TensorCores only when the chip actually has >=2 (v7x).
    split = 2 if (_tensorcores_per_chip() >= 2 and cout % 2 == 0 and (cout // 2) % 8 == 0) else 1
    cout_blk = cout // split
    semantics = ("parallel",) if split > 1 else ("arbitrary",)

    # Actual kernel DMA: bf16 weight in, f32 activation in, f32 output out.
    cost = pl.CostEstimate(
        flops=2 * hw * cin * cout,
        transcendentals=0,
        bytes_accessed=w_bf16.size * 2 + x_mat.size * 4 + cout * hw * 4,
    )

    out_mat = pl.pallas_call(
        conv1x1_kernel,
        out_shape=jax.ShapeDtypeStruct((cout, hw), jnp.float32),
        grid=(split,),
        in_specs=[
            pl.BlockSpec((cout_blk, cin), lambda i: (i, 0)),  # weight: per-core half (or full)
            pl.BlockSpec((cin, hw), lambda i: (0, 0)),        # activation: full block
        ],
        out_specs=pl.BlockSpec((cout_blk, hw), lambda i: (i, 0)),
        compiler_params=pltpu.CompilerParams(
            dimension_semantics=semantics,
        ),
        cost_estimate=cost,
    )(w_bf16, x_mat)

    if n == 1:
        return out_mat.reshape(1, cout, h, w)  # contiguous, no transpose
    return jnp.moveaxis(out_mat.reshape(cout, n, h, w), 1, 0)


if __name__ == "__main__":
    key = jax.random.PRNGKey(0)
    kx, kw = jax.random.split(key)

    # Shapes from the module: input [1, 1152, 7, 7], weight [128, 1152, 1, 1]
    x = jax.random.normal(kx, (1, 1152, 7, 7), dtype=jnp.float32)
    weight = jax.random.normal(kw, (128, 1152, 1, 1), dtype=jnp.float32) * 0.02

    # One-time init-time weight prep (outside the per-call path).
    w_bf = prepare_conv1x1_weight(weight)

    out = jax.block_until_ready(conv2d_1x1(x, w_bf))

    # Reference through the same bf16-input / f32-accumulate precision path.
    x_ref = x.astype(jnp.bfloat16).astype(jnp.float32)
    w_ref = w_bf.astype(jnp.float32)
    ref = jnp.einsum("nchw,oc->nohw", x_ref, w_ref)

    assert out.shape == (1, 128, 7, 7)
    assert out.dtype == jnp.float32
    assert jnp.allclose(out, ref, atol=1e-3, rtol=1e-3), float(
        jnp.max(jnp.abs(out - ref))
    )

    print("KERNEL_OK")
</pallas_src>

<mosaic_0001>
module attributes {stable_mosaic.version = 11 : i64} {
  func.func @conv1x1_kernel(%arg0: i32, %arg1: memref<128x1152xbf16, #tpu.memory_space<vmem>>, %arg2: memref<1152x49xf32, #tpu.memory_space<vmem>>, %arg3: memref<128x49xf32, #tpu.memory_space<vmem>>) attributes {dimension_semantics = [#tpu.dimension_semantics<arbitrary>], iteration_bounds = array<i64: 1>, scalar_prefetch = 0 : i64, scratch_operands = 0 : i64, tpu.core_type = #tpu.core_type<tc>, window_params = [{transform_indices = @transform_0, window_bounds = array<i64: 128, 1152>}, {pipeline_mode = #tpu.pipeline_mode<synchronous>, transform_indices = @transform_1, window_bounds = array<i64: 1152, 49>}, {transform_indices = @transform_2, window_bounds = array<i64: 128, 49>}]} {
    %c0 = arith.constant 0 : index
    %c0_0 = arith.constant 0 : index
    %0 = vector.load %arg1[%c0, %c0_0] : memref<128x1152xbf16, #tpu.memory_space<vmem>>, vector<128x1152xbf16>
    %c0_1 = arith.constant 0 : index
    %c0_2 = arith.constant 0 : index
    %1 = vector.load %arg2[%c0_1, %c0_2] : memref<1152x49xf32, #tpu.memory_space<vmem>>, vector<1152x49xf32>
    %2 = arith.truncf %1 : vector<1152x49xf32> to vector<1152x49xbf16>
    %cst = arith.constant dense<0.000000e+00> : vector<128x49xf32>
    %3 = tpu.matmul %0, %2, %cst {dimension_numbers = #tpu.dot_dimension_numbers<[1], [0], [0], [1], [0, 0, 1, 1], [], []>} : vector<128x1152xbf16>, vector<1152x49xbf16>, vector<128x49xf32> -> vector<128x49xf32>
    %c0_3 = arith.constant 0 : index
    %c0_4 = arith.constant 0 : index
    %4 = vector.load %arg3[%c0_3, %c0_4] : memref<128x49xf32, #tpu.memory_space<vmem>>, vector<128x49xf32>
    tpu.vector_store %arg3[%c0_3, %c0_4], %3 {strides = array<i32>} : memref<128x49xf32, #tpu.memory_space<vmem>>, vector<128x49xf32>,
    return
  }
  func.func @transform_0(%arg0: i32) -> (i32, i32) {
    %c0_i32 = arith.constant 0 : i32
    %c0_i32_0 = arith.constant 0 : i32
    return %arg0, %c0_i32 : i32, i32
  }
  func.func @transform_1(%arg0: i32) -> (i32, i32) {
    %c0_i32 = arith.constant 0 : i32
    %c0_i32_0 = arith.constant 0 : i32
    %c0_i32_1 = arith.constant 0 : i32
    return %c0_i32, %c0_i32_0 : i32, i32
  }
  func.func @transform_2(%arg0: i32) -> (i32, i32) {
    %c0_i32 = arith.constant 0 : i32
    %c0_i32_0 = arith.constant 0 : i32
    return %arg0, %c0_i32 : i32, i32
  }
}

</mosaic_0001>

<bundles_post_ra>
// kernel: tpu_custom_call.1
= control target key start
LH: loop header
LB: loop body
LE: loop exit
PB: predicated region body
PF: predicated region fallthrough
CT: control target
= control target key end

     0   :  { %vm1161_vm0 = vcmask 400384   ;;  %s2543_s1 = inlined_call_operand.vmem [shape: f32[1152,49], index: 1, kind: input, shape index: {}]   ;;  %s2544_s0 = inlined_call_operand.vmem [shape: bf16[128,1152], index: 0, kind: input, shape index: {}]   ;;  %s2545_s2 = inlined_call_operand.vmem [shape: f32[128,49], index: 2, kind: output, shape index: {}]  }
   0x1   :  { %v122_v0 = vld [vmem:[%s2543_s1 + $0xf0] sm:$0xff]  ;;  %v123_v1 = vld [vmem:[%s2543_s1 + $0xf8] sm:$0xff]  ;;  %v120_v11 = vld [vmem:[%s2543_s1 + $0xe0] sm:$0xff] }
   0x2   :  { %v154_v2 = vld [vmem:[%s2543_s1 + $0x1f0] sm:$0xff]  ;;  %v251_v3 = vpack.c.bf16 %v123_v1, %v122_v0  ;;  %v155_v4 = vld [vmem:[%s2543_s1 + $0x1f8] sm:$0xff]  ;;  %v121_v13 = vld [vmem:[%s2543_s1 + $0xe8] sm:$0xff] }
   0x3   :  { %v106_v5 = vld [vmem:[%s2543_s1 + $0x70] sm:$0xff]  ;;  %v107_v6 = vld [vmem:[%s2543_s1 + $0x78] sm:$0xff]  ;;  %v267_v7 = vpack.c.bf16 %v155_v4, %v154_v2  ;;  %v152_v14 = vld [vmem:[%s2543_s1 + $0x1e0] sm:$0xff]  ;;  %v250_v16 = vpack.c.bf16 %v121_v13, %v120_v11 }
   0x4   :  { %v243_v8 = vpack.c.bf16 %v107_v6, %v106_v5  ;;  %v138_v9 = vld [vmem:[%s2543_s1 + $0x170] sm:$0xff]  ;;  %v139_v10 = vld [vmem:[%s2543_s1 + $0x178] sm:$0xff]  ;;  %1254 = vmatprep.subr.bf16.mxu0 %v251_v3  ;;  %v153_v15 = vld [vmem:[%s2543_s1 + $0x1e8] sm:$0xff] }
   0x5   :  { %v259_v12 = vpack.c.bf16 %v139_v10, %v138_v9  ;;  %1318 = vmatprep.subr.bf16.mxu1 %v267_v7  ;;  %v266_v17 = vpack.c.bf16 %v153_v15, %v152_v14  ;;  %v104_v18 = vld [vmem:[%s2543_s1 + $0x60] sm:$0xff]  ;;  %v105_v19 = vld [vmem:[%s2543_s1 + $0x68] sm:$0xff]  ;;  %v118_v23 = vld [vmem:[%s2543_s1 + $0xd0] sm:$0xff] }
   0x6   :  { %1255 = vmatpush3.bf16.msra.mxu0 %v243_v8  ;;  %v136_v20 = vld [vmem:[%s2543_s1 + $0x160] sm:$0xff]  ;;  %v242_v21 = vpack.c.bf16 %v105_v19, %v104_v18  ;;  %v137_v22 = vld [vmem:[%s2543_s1 + $0x168] sm:$0xff]  ;;  %v119_v24 = vld [vmem:[%s2543_s1 + $0xd8] sm:$0xff] }
   0x7   :  { %1319 = vmatpush3.bf16.msra.mxu1 %v259_v12  ;;  %1256 = vmatprep.subr.bf16.mxu0 %v250_v16  ;;  %v258_v25 = vpack.c.bf16 %v137_v22, %v136_v20  ;;  %v249_v26 = vpack.c.bf16 %v119_v24, %v118_v23  ;;  %v150_v27 = vld [vmem:[%s2543_s1 + $0x1d0] sm:$0xff]  ;;  %v151_v28 = vld [vmem:[%s2543_s1 + $0x1d8] sm:$0xff]  ;;  %v116_v35 = vld [vmem:[%s2543_s1 + $0xc0] sm:$0xff] }
   0x8   :  { %1320 = vmatprep.subr.bf16.mxu1 %v266_v17  ;;  %v102_v29 = vld [vmem:[%s2543_s1 + $0x50] sm:$0xff]  ;;  %v265_v30 = vpack.c.bf16 %v151_v28, %v150_v27  ;;  %v103_v31 = vld [vmem:[%s2543_s1 + $0x58] sm:$0xff]  ;;  %v117_v36 = vld [vmem:[%s2543_s1 + $0xc8] sm:$0xff] }
   0x9   :  { %v134_v32 = vld [vmem:[%s2543_s1 + $0x150] sm:$0xff]  ;;  %v135_v33 = vld [vmem:[%s2543_s1 + $0x158] sm:$0xff]  ;;  %v241_v34 = vpack.c.bf16 %v103_v31, %v102_v29  ;;  %v148_v37 = vld [vmem:[%s2543_s1 + $0x1c0] sm:$0xff]  ;;  %v248_v39 = vpack.c.bf16 %v117_v36, %v116_v35 }
   0xa   :  { %1257 = vmatpush3.bf16.msra.mxu0 %v242_v21  ;;  %v257_v38 = vpack.c.bf16 %v135_v33, %v134_v32  ;;  %v149_v40 = vld [vmem:[%s2543_s1 + $0x1c8] sm:$0xff]  ;;  %v100_v41 = vld [vmem:[%s2543_s1 + $0x40] sm:$0xff]  ;;  %v114_v46 = vld [vmem:[%s2543_s1 + $0xb0] sm:$0xff] }
   0xb   :  { %1321 = vmatpush3.bf16.msra.mxu1 %v258_v25  ;;  %1258 = vmatprep.subr.bf16.mxu0 %v249_v26  ;;  %v101_v42 = vld [vmem:[%s2543_s1 + $0x48] sm:$0xff]  ;;  %v264_v43 = vpack.c.bf16 %v149_v40, %v148_v37  ;;  %v132_v44 = vld [vmem:[%s2543_s1 + $0x140] sm:$0xff]  ;;  %v115_v47 = vld [vmem:[%s2543_s1 + $0xb8] sm:$0xff] }
   0xc   :  { %1322 = vmatprep.subr.bf16.mxu1 %v265_v30  ;;  %v133_v45 = vld [vmem:[%s2543_s1 + $0x148] sm:$0xff]  ;;  %v146_v48 = vld [vmem:[%s2543_s1 + $0x1b0] sm:$0xff]  ;;  %v147_v49 = vld [vmem:[%s2543_s1 + $0x1b8] sm:$0xff]  ;;  %v240_v50 = vpack.c.bf16 %v101_v42, %v100_v41  ;;  %v247_v52 = vpack.c.bf16 %v115_v47, %v114_v46 }
   0xd   :  { %v256_v51 = vpack.c.bf16 %v133_v45, %v132_v44  ;;  %v98_v53 = vld [vmem:[%s2543_s1 + $0x30] sm:$0xff]  ;;  %v99_v54 = vld [vmem:[%s2543_s1 + $0x38] sm:$0xff]  ;;  %v263_v56 = vpack.c.bf16 %v147_v49, %v146_v48  ;;  %v112_v58 = vld [vmem:[%s2543_s1 + $0xa0] sm:$0xff] }
   0xe   :  { %1259 = vmatpush3.bf16.msra.mxu0 %v241_v34  ;;  %v130_v55 = vld [vmem:[%s2543_s1 + $0x130] sm:$0xff]  ;;  %v131_v57 = vld [vmem:[%s2543_s1 + $0x138] sm:$0xff]  ;;  %v113_v59 = vld [vmem:[%s2543_s1 + $0xa8] sm:$0xff]  ;;  %v239_v62 = vpack.c.bf16 %v99_v54, %v98_v53 }
   0xf   :  { %1323 = vmatpush3.bf16.msra.mxu1 %v257_v38  ;;  %1260 = vmatprep.subr.bf16.mxu0 %v248_v39  ;;  %v144_v60 = vld [vmem:[%s2543_s1 + $0x1a0] sm:$0xff]  ;;  %v145_v61 = vld [vmem:[%s2543_s1 + $0x1a8] sm:$0xff]  ;;  %v255_v0 = vpack.c.bf16 %v131_v57, %v130_v55  ;;  %v246_v1 = vpack.c.bf16 %v113_v59, %v112_v58  ;;  %v110_v6 = vld [vmem:[%s2543_s1 + $0x90] sm:$0xff] }
  0x10   :  { %1324 = vmatprep.subr.bf16.mxu1 %v264_v43  ;;  %v96_v63 = vld [vmem:[%s2543_s1 + $0x20] sm:$0xff]  ;;  %v97_v2 = vld [vmem:[%s2543_s1 + $0x28] sm:$0xff]  ;;  %v262_v5 = vpack.c.bf16 %v145_v61, %v144_v60  ;;  %v111_v7 = vld [vmem:[%s2543_s1 + $0x98] sm:$0xff] }
  0x11   :  { %v128_v3 = vld [vmem:[%s2543_s1 + $0x120] sm:$0xff]  ;;  %v129_v4 = vld [vmem:[%s2543_s1 + $0x128] sm:$0xff]  ;;  %v142_v8 = vld [vmem:[%s2543_s1 + $0x190] sm:$0xff]  ;;  %v238_v12 = vpack.c.bf16 %v97_v2, %v96_v63  ;;  %v245_v17 = vpack.c.bf16 %v111_v7, %v110_v6 }
  0x12   :  { %1261 = vmatpush3.bf16.msra.mxu0 %v240_v50  ;;  %v143_v9 = vld [vmem:[%s2543_s1 + $0x198] sm:$0xff]  ;;  %v94_v10 = vld [vmem:[%s2543_s1 + $0x10] sm:$0xff]  ;;  %v108_v15 = vld [vmem:[%s2543_s1 + $0x80] sm:$0xff]  ;;  %v254_v16 = vpack.c.bf16 %v129_v4, %v128_v3 }
  0x13   :  { %1325 = vmatpush3.bf16.msra.mxu1 %v256_v51  ;;  %1262 = vmatprep.subr.bf16.mxu0 %v247_v52  ;;  %v95_v11 = vld [vmem:[%s2543_s1 + $0x18] sm:$0xff]  ;;  %v126_v13 = vld [vmem:[%s2543_s1 + $0x110] sm:$0xff]  ;;  %v109_v18 = vld [vmem:[%s2543_s1 + $0x88] sm:$0xff]  ;;  %v261_v19 = vpack.c.bf16 %v143_v9, %v142_v8 }
  0x14   :  { %1326 = vmatprep.subr.bf16.mxu1 %v263_v56  ;;  %v127_v14 = vld [vmem:[%s2543_s1 + $0x118] sm:$0xff]  ;;  %v140_v20 = vld [vmem:[%s2543_s1 + $0x180] sm:$0xff]  ;;  %v141_v22 = vld [vmem:[%s2543_s1 + $0x188] sm:$0xff]  ;;  %v237_v24 = vpack.c.bf16 %v95_v11, %v94_v10  ;;  %v244_v28 = vpack.c.bf16 %v109_v18, %v108_v15 }
  0x15   :  { %v1576_v21 = vld [vmem:[%s2544_s0 + $0x4] ss:$36 sps:$4 sm:$0xff]   ;;  %v1579_v23 = vld [vmem:[%s2544_s0 + $0xc] ss:$36 sps:$4 sm:$0xff]   ;;  %v253_v27 = vpack.c.bf16 %v127_v14, %v126_v13  ;;  %v260_v32 = vpack.c.bf16 %v141_v22, %v140_v20  ;;  %v187_v33 = vld [vmem:[%s2543_s1 + $0x2f8] sm:$0xff] }
  0x16   :  { %1263 = vmatpush3.bf16.msra.mxu0 %v239_v62  ;;  %v92_v25 = vld [vmem:[%s2543_s1] sm:$0xff]  ;;  %v93_v26 = vld [vmem:[%s2543_s1 + $0x8] sm:$0xff]  ;;  %708 = vmatprep.mubr.bf16.mxu0 %v1576_v21  ;;  %v186_v31 = vld [vmem:[%s2543_s1 + $0x2f0] sm:$0xff] }
  0x17   :  { %1327 = vmatpush3.bf16.msra.mxu1 %v255_v0  ;;  %1264 = vmatprep.subr.bf16.mxu0 %v246_v1  ;;  %v124_v29 = vld [vmem:[%s2543_s1 + $0x100] sm:$0xff]  ;;  %v125_v30 = vld [vmem:[%s2543_s1 + $0x108] sm:$0xff]  ;;  %v218_v34 = vld [vmem:[%s2543_s1 + $0x3f0] sm:$0xff]  ;;  %v236_v36 = vpack.c.bf16 %v93_v26, %v92_v25  ;;  %v283_v39 = vpack.c.bf16 %v187_v33, %v186_v31 }
  0x18   :  { %1328 = vmatprep.subr.bf16.mxu1 %v262_v5  ;;  %805 = vmatprep.mubr.bf16.mxu1 %v1579_v23  ;;  %v219_v35 = vld [vmem:[%s2543_s1 + $0x3f8] sm:$0xff]  ;;  %v252_v37 = vpack.c.bf16 %v125_v30, %v124_v29  ;;  %v1574_v38 = vld [vmem:[%s2544_s0] ss:$36 sps:$4 sm:$0xff]   ;;  %v170_v40 = vld [vmem:[%s2543_s1 + $0x270] sm:$0xff] }
  0x19   :  { %v171_v41 = vld [vmem:[%s2543_s1 + $0x278] sm:$0xff]  ;;  %v1577_v42 = vld [vmem:[%s2544_s0 + $0x8] ss:$36 sps:$4 sm:$0xff]   ;;  %v299_v43 = vpack.c.bf16 %v219_v35, %v218_v34  ;;  %v202_v44 = vld [vmem:[%s2543_s1 + $0x370] sm:$0xff] }
  0x1a   :  { %1265 = vmatpush3.bf16.msra.mxu0 %v238_v12  ;;  %v203_v45 = vld [vmem:[%s2543_s1 + $0x378] sm:$0xff]  ;;  %v184_v46 = vld [vmem:[%s2543_s1 + $0x2e0] sm:$0xff]  ;;  %v1580_v47 = vld [vmem:[%s2544_s0 + $0x4c] ss:$36 sps:$4 sm:$0xff]   ;;  %v275_v51 = vpack.c.bf16 %v171_v41, %v170_v40 }
  0x1b   :  { %1329 = vmatpush3.bf16.msra.mxu1 %v254_v16  ;;  %1266 = vmatprep.subr.bf16.mxu0 %v245_v17  ;;  %v185_v48 = vld [vmem:[%s2543_s1 + $0x2e8] sm:$0xff]  ;;  %v216_v49 = vld [vmem:[%s2543_s1 + $0x3e0] sm:$0xff]  ;;  %v1582_v52 = vld [vmem:[%s2544_s0 + $0x54] ss:$36 sps:$4 sm:$0xff]   ;;  %v291_v54 = vpack.c.bf16 %v203_v45, %v202_v44 }
  0x1c   :  { %1330 = vmatprep.subr.bf16.mxu1 %v261_v19  ;;  %v217_v50 = vld [vmem:[%s2543_s1 + $0x3e8] sm:$0xff]  ;;  %v168_v53 = vld [vmem:[%s2543_s1 + $0x260] sm:$0xff]  ;;  %v282_v56 = vpack.c.bf16 %v185_v48, %v184_v46  ;;  %v182_v59 = vld [vmem:[%s2543_s1 + $0x2d0] sm:$0xff] }
  0x1d   :  { %v169_v55 = vld [vmem:[%s2543_s1 + $0x268] sm:$0xff]  ;;  %v200_v57 = vld [vmem:[%s2543_s1 + $0x360] sm:$0xff]  ;;  %v298_v60 = vpack.c.bf16 %v217_v50, %v216_v49  ;;  %v183_v61 = vld [vmem:[%s2543_s1 + $0x2d8] sm:$0xff] }
  0x1e   :  { %1267 = vmatpush3.bf16.msra.mxu0 %v237_v24  ;;  %v201_v58 = vld [vmem:[%s2543_s1 + $0x368] sm:$0xff]  ;;  %v214_v62 = vld [vmem:[%s2543_s1 + $0x3d0] sm:$0xff]  ;;  %v215_v63 = vld [vmem:[%s2543_s1 + $0x3d8] sm:$0xff]  ;;  %v274_v0 = vpack.c.bf16 %v169_v55, %v168_v53  ;;  %v281_v3 = vpack.c.bf16 %v183_v61, %v182_v59 }
  0x1f   :  { %1331 = vmatpush3.bf16.msra.mxu1 %v253_v27  ;;  %1268 = vmatprep.subr.bf16.mxu0 %v244_v28  ;;  %v1584_v1 = vld [vmem:[%s2544_s0 + $0x48] ss:$36 sps:$4 sm:$0xff]   ;;  %v290_v2 = vpack.c.bf16 %v201_v58, %v200_v57  ;;  %v166_v4 = vld [vmem:[%s2543_s1 + $0x250] sm:$0xff]  ;;  %v297_v6 = vpack.c.bf16 %v215_v63, %v214_v62  ;;  %v167_v7 = vld [vmem:[%s2543_s1 + $0x258] sm:$0xff] }
  0x20   :  { %1332 = vmatprep.subr.bf16.mxu1 %v260_v32  ;;  %v1585_v5 = vld [vmem:[%s2544_s0 + $0x50] ss:$36 sps:$4 sm:$0xff]   ;;  %v199_v10 = vld [vmem:[%s2543_s1 + $0x358] sm:$0xff]  ;;  %v180_v11 = vld [vmem:[%s2543_s1 + $0x2c0] sm:$0xff]  ;;  %v273_v15 = vpack.c.bf16 %v167_v7, %v166_v4 }
  0x21   :  { %v1586_v8 = vld [vmem:[%s2544_s0 + $0x94] ss:$36 sps:$4 sm:$0xff]   ;;  %v181_v12 = vld [vmem:[%s2543_s1 + $0x2c8] sm:$0xff]  ;;  %v212_v13 = vld [vmem:[%s2543_s1 + $0x3c0] sm:$0xff] }
  0x22   :  { %1269 = vmatpush3.bf16.msra.mxu0 %v236_v36  ;;  %v198_v9 = vld [vmem:[%s2543_s1 + $0x350] sm:$0xff]  ;;  %v1588_v14 = vld [vmem:[%s2544_s0 + $0x9c] ss:$36 sps:$4 sm:$0xff]   ;;  %v213_v16 = vld [vmem:[%s2543_s1 + $0x3c8] sm:$0xff]  ;;  %v280_v19 = vpack.c.bf16 %v181_v12, %v180_v11 }
  0x23   :  { %1333 = vmatpush3.bf16.msra.mxu1 %v252_v37  ;;  %1382 = vmatprep.subr.bf16.mxu0 %v283_v39  ;;  %v164_v17 = vld [vmem:[%s2543_s1 + $0x240] sm:$0xff]  ;;  %v289_v18 = vpack.c.bf16 %v199_v10, %v198_v9  ;;  %v165_v20 = vld [vmem:[%s2543_s1 + $0x248] sm:$0xff]  ;;  %v296_v22 = vpack.c.bf16 %v213_v16, %v212_v13  ;;  %v1590_v24 = vld [vmem:[%s2544_s0 + $0x90] ss:$36 sps:$4 sm:$0xff]  }
  0x24   :  { %1446 = vmatprep.subr.bf16.mxu1 %v299_v43  ;;  %v196_v21 = vld [vmem:[%s2543_s1 + $0x340] sm:$0xff]  ;;  %v197_v23 = vld [vmem:[%s2543_s1 + $0x348] sm:$0xff]  ;;  %v272_v25 = vpack.c.bf16 %v165_v20, %v164_v17  ;;  %v178_v26 = vld [vmem:[%s2543_s1 + $0x2b0] sm:$0xff] }
  0x25   :  { %709 = vmatmul.mubr.bf16.vlgmr.msra.gmra.mxu0 %v1574_v38  ;;  %v179_v27 = vld [vmem:[%s2543_s1 + $0x2b8] sm:$0xff]  ;;  %v288_v29 = vpack.c.bf16 %v197_v23, %v196_v21  ;;  %v210_v31 = vld [vmem:[%s2543_s1 + $0x3b0] sm:$0xff]  ;;  %v1594_v39 = vld [vmem:[%s2544_s0 + $0xe4] ss:$36 sps:$4 sm:$0xff]  }
  0x26   :  { %806 = vmatmul.mubr.bf16.vlgmr.msra.gmra.mxu1 %v1577_v42  ;;  %1383 = vmatpush3.bf16.msra.mxu0 %v275_v51  ;;  %v1591_v28 = vld [vmem:[%s2544_s0 + $0x98] ss:$36 sps:$4 sm:$0xff]   ;;  %v279_v30 = vpack.c.bf16 %v179_v27, %v178_v26  ;;  %v162_v33 = vld [vmem:[%s2543_s1 + $0x230] sm:$0xff]  ;;  %v176_v42 = vld [vmem:[%s2543_s1 + $0x2a0] sm:$0xff] }
  0x27   :  { %1447 = vmatpush3.bf16.msra.mxu1 %v291_v54  ;;  %716 = vmatprep.mubr.bf16.mxu0 %v1580_v47  ;;  %v211_v32 = vld [vmem:[%s2543_s1 + $0x3b8] sm:$0xff]  ;;  %v194_v36 = vld [vmem:[%s2543_s1 + $0x330] sm:$0xff]  ;;  %v177_v43 = vld [vmem:[%s2543_s1 + $0x2a8] sm:$0xff] }
  0x28   :  { %813 = vmatprep.mubr.bf16.mxu1 %v1582_v52  ;;  %1384 = vmatprep.subr.bf16.mxu0 %v282_v56  ;;  %v295_v34 = vpack.c.bf16 %v211_v32, %v210_v31  ;;  %v163_v35 = vld [vmem:[%s2543_s1 + $0x238] sm:$0xff]  ;;  %v208_v44 = vld [vmem:[%s2543_s1 + $0x3a0] sm:$0xff]  ;;  %v209_v45 = vld [vmem:[%s2543_s1 + $0x3a8] sm:$0xff]  ;;  %v278_v46 = vpack.c.bf16 %v177_v43, %v176_v42 }
  0x29   :  { %1448 = vmatprep.subr.bf16.mxu1 %v298_v60  ;;  %v195_v37 = vld [vmem:[%s2543_s1 + $0x338] sm:$0xff]  ;;  %v271_v40 = vpack.c.bf16 %v163_v35, %v162_v33  ;;  %v294_v47 = vpack.c.bf16 %v209_v45, %v208_v44  ;;  %v160_v48 = vld [vmem:[%s2543_s1 + $0x220] sm:$0xff]  ;;  %v161_v49 = vld [vmem:[%s2543_s1 + $0x228] sm:$0xff] }
  0x2a   :  { %1385 = vmatpush3.bf16.msra.mxu0 %v274_v0  ;;  %v1592_v38 = vld [vmem:[%s2544_s0 + $0xdc] ss:$36 sps:$4 sm:$0xff]   ;;  %v287_v41 = vpack.c.bf16 %v195_v37, %v194_v36  ;;  %v270_v51 = vpack.c.bf16 %v161_v49, %v160_v48  ;;  %v193_v52 = vld [vmem:[%s2543_s1 + $0x328] sm:$0xff]  ;;  %v174_v58 = vld [vmem:[%s2543_s1 + $0x290] sm:$0xff] }
  0x2b   :  { %1449 = vmatpush3.bf16.msra.mxu1 %v290_v2  ;;  %1386 = vmatprep.subr.bf16.mxu0 %v281_v3  ;;  %v192_v50 = vld [vmem:[%s2543_s1 + $0x320] sm:$0xff]  ;;  %v1596_v53 = vld [vmem:[%s2544_s0 + $0xd8] ss:$36 sps:$4 sm:$0xff]   ;;  %v1600_v57 = vld [vmem:[%s2544_s0 + $0x12c] ss:$36 sps:$4 sm:$0xff]  }
  0x2c   :  { %1450 = vmatprep.subr.bf16.mxu1 %v297_v6  ;;  %v286_v54 = vpack.c.bf16 %v193_v52, %v192_v50  ;;  %v1597_v55 = vld [vmem:[%s2544_s0 + $0xe0] ss:$36 sps:$4 sm:$0xff]   ;;  %v175_v59 = vld [vmem:[%s2543_s1 + $0x298] sm:$0xff]  ;;  %v206_v60 = vld [vmem:[%s2543_s1 + $0x390] sm:$0xff] }
  0x2d   :  { %717 = vmatmul.mubr.bf16.gmra.mxu0 %v1584_v1  ;;  %v1598_v56 = vld [vmem:[%s2544_s0 + $0x124] ss:$36 sps:$4 sm:$0xff]   ;;  %v277_v61 = vpack.c.bf16 %v175_v59, %v174_v58  ;;  %v207_v62 = vld [vmem:[%s2543_s1 + $0x398] sm:$0xff]  ;;  %v158_v63 = vld [vmem:[%s2543_s1 + $0x210] sm:$0xff] }
  0x2e   :  { %814 = vmatmul.mubr.bf16.gmra.mxu1 %v1585_v5  ;;  %724 = vmatprep.mubr.bf16.mxu0 %v1586_v8  ;;  %v159_v0 = vld [vmem:[%s2543_s1 + $0x218] sm:$0xff]  ;;  %v293_v1 = vpack.c.bf16 %v207_v62, %v206_v60  ;;  %v190_v3 = vld [vmem:[%s2543_s1 + $0x310] sm:$0xff]  ;;  %v1602_v6 = vld [vmem:[%s2544_s0 + $0x120] ss:$36 sps:$4 sm:$0xff]  }
  0x2f   :  { %821 = vmatprep.mubr.bf16.mxu1 %v1588_v14  ;;  %1387 = vmatpush3.bf16.msra.mxu0 %v273_v15  ;;  %v269_v2 = vpack.c.bf16 %v159_v0, %v158_v63  ;;  %v191_v4 = vld [vmem:[%s2543_s1 + $0x318] sm:$0xff]  ;;  %v172_v7 = vld [vmem:[%s2543_s1 + $0x280] sm:$0xff]  ;;  %v173_v8 = vld [vmem:[%s2543_s1 + $0x288] sm:$0xff] }
  0x30   :  { %1451 = vmatpush3.bf16.msra.mxu1 %v289_v18  ;;  %1388 = vmatprep.subr.bf16.mxu0 %v280_v19  ;;  %v285_v5 = vpack.c.bf16 %v191_v4, %v190_v3  ;;  %v1603_v9 = vld [vmem:[%s2544_s0 + $0x128] ss:$36 sps:$4 sm:$0xff]   ;;  %v276_v10 = vpack.c.bf16 %v173_v8, %v172_v7  ;;  %v204_v11 = vld [vmem:[%s2543_s1 + $0x380] sm:$0xff]  ;;  %v1606_v21 = vld [vmem:[%s2544_s0 + $0x174] ss:$36 sps:$4 sm:$0xff]  }
  0x31   :  { %1452 = vmatprep.subr.bf16.mxu1 %v296_v22  ;;  %v205_v12 = vld [vmem:[%s2543_s1 + $0x388] sm:$0xff]  ;;  %v156_v13 = vld [vmem:[%s2543_s1 + $0x200] sm:$0xff]  ;;  %v234_v22 = vld [vmem:[%s2543_s1 + $0x470] sm:$0xff] }
  0x32   :  { %v292_v14 = vpack.c.bf16 %v205_v12, %v204_v11  ;;  %v157_v15 = vld [vmem:[%s2543_s1 + $0x208] sm:$0xff]  ;;  %v188_v16 = vld [vmem:[%s2543_s1 + $0x300] sm:$0xff]  ;;  %v235_v23 = vld [vmem:[%s2543_s1 + $0x478] sm:$0xff] }
  0x33   :  { %1389 = vmatpush3.bf16.msra.mxu0 %v272_v25  ;;  %v189_v17 = vld [vmem:[%s2543_s1 + $0x308] sm:$0xff]  ;;  %v268_v19 = vpack.c.bf16 %v157_v15, %v156_v13  ;;  %v1609_v26 = vld [vmem:[%s2544_s0 + $0x170] ss:$36 sps:$4 sm:$0xff]   ;;  %v1616_v31 = vld [vmem:[%s2544_s0 + $0x1fc] ss:$36 sps:$4 sm:$0xff]  }
  0x34   :  { %1453 = vmatpush3.bf16.msra.mxu1 %v288_v29  ;;  %1390 = vmatprep.subr.bf16.mxu0 %v279_v30  ;;  %v1604_v18 = vld [vmem:[%s2544_s0 + $0x16c] ss:$36 sps:$4 sm:$0xff]   ;;  %v284_v20 = vpack.c.bf16 %v189_v17, %v188_v16  ;;  %v1610_v27 = vld [vmem:[%s2544_s0 + $0x1b4] ss:$36 sps:$4 sm:$0xff]   ;;  %v1618_v32 = vld [vmem:[%s2544_s0 + $0x204] ss:$36 sps:$4 sm:$0xff]  }
  0x35   :  { %725 = vmatmul.mubr.bf16.gmra.mxu0 %v1590_v24  ;;  %1454 = vmatprep.subr.bf16.mxu1 %v295_v34  ;;  %v307_v24 = vpack.c.bf16 %v235_v23, %v234_v22  ;;  %v1608_v25 = vld [vmem:[%s2544_s0 + $0x168] ss:$36 sps:$4 sm:$0xff]   ;;  %v1614_v29 = vld [vmem:[%s2544_s0 + $0x1b0] ss:$36 sps:$4 sm:$0xff]   ;;  %v1615_v30 = vld [vmem:[%s2544_s0 + $0x1b8] ss:$36 sps:$4 sm:$0xff]  }
  0x36   :  { %822 = vmatmul.mubr.bf16.gmra.mxu1 %v1591_v28  ;;  %732 = vmatprep.mubr.bf16.mxu0 %v1592_v38  ;;  %v1612_v28 = vld [vmem:[%s2544_s0 + $0x1bc] ss:$36 sps:$4 sm:$0xff]   ;;  %v1624_v35 = vld [vmem:[%s2544_s0 + $0x14] ss:$36 sps:$4 sm:$0xff]   ;;  %v1630_v42 = vld [vmem:[%s2544_s0 + $0x64] ss:$36 sps:$4 sm:$0xff]  }
  0x37   :  { %829 = vmatprep.mubr.bf16.mxu1 %v1594_v39  ;;  %1391 = vmatpush3.bf16.msra.mxu0 %v271_v40  ;;  %v1620_v33 = vld [vmem:[%s2544_s0 + $0x1f8] ss:$36 sps:$4 sm:$0xff]   ;;  %v1621_v34 = vld [vmem:[%s2544_s0 + $0x200] ss:$36 sps:$4 sm:$0xff]   ;;  %v1622_v37 = vld [vmem:[%s2544_s0 + $0x10] ss:$36 sps:$4 sm:$0xff]  }
  0x38   :  { %1455 = vmatpush3.bf16.msra.mxu1 %v287_v41  ;;  %1392 = vmatprep.subr.bf16.mxu0 %v278_v46  ;;  %v1627_v36 = vld [vmem:[%s2544_s0 + $0x1c] ss:$36 sps:$4 sm:$0xff]   ;;  %v233_v40 = vld [vmem:[%s2543_s1 + $0x468] sm:$0xff]  ;;  %v230_v44 = vld [vmem:[%s2543_s1 + $0x450] sm:$0xff] }
  0x39   :  { %1456 = vmatprep.subr.bf16.mxu1 %v294_v47  ;;  %v1625_v38 = vld [vmem:[%s2544_s0 + $0x18] ss:$36 sps:$4 sm:$0xff]   ;;  %v232_v39 = vld [vmem:[%s2543_s1 + $0x460] sm:$0xff]  ;;  %v229_v49 = vld [vmem:[%s2543_s1 + $0x448] sm:$0xff] }
  0x3a   :  { %v1628_v41 = vld [vmem:[%s2544_s0 + $0x5c] ss:$36 sps:$4 sm:$0xff]   ;;  %v306_v43 = vpack.c.bf16 %v233_v40, %v232_v39  ;;  %v1636_v52 = vld [vmem:[%s2544_s0 + $0xac] ss:$36 sps:$4 sm:$0xff]   ;;  %v1642_v62 = vld [vmem:[%s2544_s0 + $0xf4] ss:$36 sps:$4 sm:$0xff]  }
  0x3b   :  { %1393 = vmatpush3.bf16.msra.mxu0 %v270_v51  ;;  %v231_v45 = vld [vmem:[%s2543_s1 + $0x458] sm:$0xff]  ;;  %v228_v48 = vld [vmem:[%s2543_s1 + $0x440] sm:$0xff]  ;;  %v225_v59 = vld [vmem:[%s2543_s1 + $0x428] sm:$0xff] }
  0x3c   :  { %1457 = vmatpush3.bf16.msra.mxu1 %v286_v54  ;;  %1394 = vmatprep.subr.bf16.mxu0 %v277_v61  ;;  %v305_v46 = vpack.c.bf16 %v231_v45, %v230_v44  ;;  %v1632_v47 = vld [vmem:[%s2544_s0 + $0x58] ss:$36 sps:$4 sm:$0xff]   ;;  %v1633_v50 = vld [vmem:[%s2544_s0 + $0x60] ss:$36 sps:$4 sm:$0xff]   ;;  %v226_v54 = vld [vmem:[%s2543_s1 + $0x430] sm:$0xff] }
  0x3d   :  { %733 = vmatmul.mubr.bf16.gmra.mxu0 %v1596_v53  ;;  %1458 = vmatprep.subr.bf16.mxu1 %v293_v1  ;;  %v1634_v51 = vld [vmem:[%s2544_s0 + $0xa4] ss:$36 sps:$4 sm:$0xff]   ;;  %v304_v53 = vpack.c.bf16 %v229_v49, %v228_v48  ;;  %v1640_v61 = vld [vmem:[%s2544_s0 + $0xec] ss:$36 sps:$4 sm:$0xff]   ;;  %v223_v1 = vld [vmem:[%s2543_s1 + $0x418] sm:$0xff] }
  0x3e   :  { %830 = vmatmul.mubr.bf16.gmra.mxu1 %v1597_v55  ;;  %740 = vmatprep.mubr.bf16.mxu0 %v1598_v56  ;;  %v227_v55 = vld [vmem:[%s2543_s1 + $0x438] sm:$0xff]  ;;  %v224_v58 = vld [vmem:[%s2543_s1 + $0x420] sm:$0xff]  ;;  %v1639_v60 = vld [vmem:[%s2544_s0 + $0xa8] ss:$36 sps:$4 sm:$0xff]  }
  0x3f   :  { %837 = vmatprep.mubr.bf16.mxu1 %v1600_v57  ;;  %1395 = vmatpush3.bf16.msra.mxu0 %v269_v2  ;;  %v303_v56 = vpack.c.bf16 %v227_v55, %v226_v54  ;;  %v1638_v57 = vld [vmem:[%s2544_s0 + $0xa0] ss:$36 sps:$4 sm:$0xff]   ;;  %v302_v63 = vpack.c.bf16 %v225_v59, %v224_v58  ;;  %v222_v0 = vld [vmem:[%s2543_s1 + $0x410] sm:$0xff]  ;;  %v1644_v3 = vld [vmem:[%s2544_s0 + $0xe8] ss:$36 sps:$4 sm:$0xff]  }
  0x40   :  { %1459 = vmatpush3.bf16.msra.mxu1 %v285_v5  ;;  %1396 = vmatprep.subr.bf16.mxu0 %v276_v10  ;;  %v301_v2 = vpack.c.bf16 %v223_v1, %v222_v0  ;;  %v220_v4 = vld [vmem:[%s2543_s1 + $0x400] sm:$0xff]  ;;  %v221_v5 = vld [vmem:[%s2543_s1 + $0x408] sm:$0xff]  ;;  %v1646_v7 = vld [vmem:[%s2544_s0 + $0x134] ss:$36 sps:$4 sm:$0xff]  }
  0x41   :  { %1460 = vmatprep.subr.bf16.mxu1 %v292_v14  ;;  %v1648_v8 = vld [vmem:[%s2544_s0 + $0x13c] ss:$36 sps:$4 sm:$0xff]   ;;  %v1650_v10 = vld [vmem:[%s2544_s0 + $0x130] ss:$36 sps:$4 sm:$0xff]   ;;  %v1654_v13 = vld [vmem:[%s2544_s0 + $0x184] ss:$36 sps:$4 sm:$0xff]  }
  0x42   :  { %v1651_v11 = vld [vmem:[%s2544_s0 + $0x138] ss:$36 sps:$4 sm:$0xff]   ;;  %v1657_v15 = vld [vmem:[%s2544_s0 + $0x180] ss:$36 sps:$4 sm:$0xff]   ;;  %v1660_v17 = vld [vmem:[%s2544_s0 + $0x1cc] ss:$36 sps:$4 sm:$0xff]  }
  0x43   :  { %1397 = vmatpush3.bf16.msra.mxu0 %v268_v19  ;;  %v1652_v12 = vld [vmem:[%s2544_s0 + $0x17c] ss:$36 sps:$4 sm:$0xff]   ;;  %v1658_v16 = vld [vmem:[%s2544_s0 + $0x1c4] ss:$36 sps:$4 sm:$0xff]   ;;  %v1669_v23 = vld [vmem:[%s2544_s0 + $0x210] ss:$36 sps:$4 sm:$0xff]  }
  0x44   :  { %1461 = vmatpush3.bf16.msra.mxu1 %v284_v20  ;;  %1526 = vmatprep.subr.bf16.mxu0 %v307_v24  ;;  %v1656_v14 = vld [vmem:[%s2544_s0 + $0x178] ss:$36 sps:$4 sm:$0xff]   ;;  %v1663_v19 = vld [vmem:[%s2544_s0 + $0x1c8] ss:$36 sps:$4 sm:$0xff]  }
  0x45   :  { %741 = vmatmul.mubr.bf16.gmra.mxu0 %v1602_v6  ;;  %1558 = vmatprep.subr.bf16.mxu1 %v307_v24  ;;  %v1645_v6 = vld [vmem:[%s2544_s0 + $0xf0] ss:$36 sps:$4 sm:$0xff]   ;;  %v1668_v22 = vld [vmem:[%s2544_s0 + $0x208] ss:$36 sps:$4 sm:$0xff]  }
  0x46   :  { %838 = vmatmul.mubr.bf16.gmra.mxu1 %v1603_v9  ;;  %748 = vmatprep.mubr.bf16.mxu0 %v1604_v18  ;;  %v300_v9 = vpack.c.bf16 %v221_v5, %v220_v4  ;;  %v1662_v18 = vld [vmem:[%s2544_s0 + $0x1c0] ss:$36 sps:$4 sm:$0xff]   ;;  %v1664_v20 = vld [vmem:[%s2544_s0 + $0x20c] ss:$36 sps:$4 sm:$0xff]  }
  0x47   :  { %845 = vmatprep.mubr.bf16.mxu1 %v1606_v21  ;;  %v1666_v21 = vld [vmem:[%s2544_s0 + $0x214] ss:$36 sps:$4 sm:$0xff]  }
  0x4d   :  { %749 = vmatmul.mubr.bf16.gmra.mxu0 %v1608_v25  ;;  %v1671_v25 = vld [vmem:[%s2544_s0 + $0x140] ss:$36 sps:$4 sm:$0xff]  }
  0x4e   :  { %846 = vmatmul.mubr.bf16.gmra.mxu1 %v1609_v26  ;;  %756 = vmatprep.mubr.bf16.mxu0 %v1610_v27  ;;  %v1672_v26 = vld [vmem:[%s2544_s0 + $0x68] ss:$36 sps:$4 sm:$0xff]  }
  0x4f   :  { %853 = vmatprep.mubr.bf16.mxu1 %v1612_v28  ;;  %v1673_v27 = vld [vmem:[%s2544_s0 + $0x188] ss:$36 sps:$4 sm:$0xff]   ;;  %v1674_v28 = vld [vmem:[%s2544_s0 + $0xb0] ss:$36 sps:$4 sm:$0xff]  }
  0x55   :  { %757 = vmatmul.mubr.bf16.gmra.mxu0 %v1614_v29  ;;  %v1675_v29 = vld [vmem:[%s2544_s0 + $0x1d0] ss:$36 sps:$4 sm:$0xff]  }
  0x56   :  { %854 = vmatmul.mubr.bf16.gmra.mxu1 %v1615_v30  ;;  %764 = vmatprep.mubr.bf16.mxu0 %v1616_v31  ;;  %v1676_v30 = vld [vmem:[%s2544_s0 + $0xf8] ss:$36 sps:$4 sm:$0xff]  }
  0x57   :  { %861 = vmatprep.mubr.bf16.mxu1 %v1618_v32  ;;  %v1677_v31 = vld [vmem:[%s2544_s0 + $0x218] ss:$36 sps:$4 sm:$0xff]  }
  0x5d   :  { %765 = vmatmul.mubr.bf16.gmra.mxu0 %v1620_v33 }
  0x5e   :  { %862 = vmatmul.mubr.bf16.gmra.mxu1 %v1621_v34  ;;  %902 = vmatprep.mubr.bf16.mxu0 %v1624_v35 }
  0x5f   :  { %999 = vmatprep.mubr.bf16.mxu1 %v1627_v36 }
  0x65   :  { %903 = vmatmul.mubr.bf16.vlgmr.msra.gmra.mxu0 %v1622_v37 }
  0x66   :  { %1000 = vmatmul.mubr.bf16.vlgmr.msra.gmra.mxu1 %v1625_v38  ;;  %1527 = vmatpush3.bf16.msra.mxu0 %v307_v24 }
  0x67   :  { %1566 = vmatpush3.bf16.msra.mxu1 %v307_v24  ;;  %910 = vmatprep.mubr.bf16.mxu0 %v1628_v41  ;;  %v1670_v24 = vld [vmem:[%s2544_s0 + $0x20] ss:$36 sps:$4 sm:$0xff]  }
  0x68   :  { %1007 = vmatprep.mubr.bf16.mxu1 %v1630_v42  ;;  %1528 = vmatprep.subr.bf16.mxu0 %v306_v43 }
  0x69   :  { %1559 = vmatprep.subr.bf16.mxu1 %v306_v43 }
  0x6a   :  { %1529 = vmatpush3.bf16.msra.mxu0 %v306_v43 }
  0x6b   :  { %1567 = vmatpush3.bf16.msra.mxu1 %v306_v43  ;;  %1530 = vmatprep.subr.bf16.mxu0 %v305_v46 }
  0x6c   :  { %1560 = vmatprep.subr.bf16.mxu1 %v305_v46 }
  0x6d   :  { %911 = vmatmul.mubr.bf16.gmra.mxu0 %v1632_v47 }
  0x6e   :  { %1008 = vmatmul.mubr.bf16.gmra.mxu1 %v1633_v50  ;;  %918 = vmatprep.mubr.bf16.mxu0 %v1634_v51 }
  0x6f   :  { %1015 = vmatprep.mubr.bf16.mxu1 %v1636_v52  ;;  %1531 = vmatpush3.bf16.msra.mxu0 %v305_v46 }
  0x70   :  { %1568 = vmatpush3.bf16.msra.mxu1 %v305_v46  ;;  %1532 = vmatprep.subr.bf16.mxu0 %v304_v53 }
  0x71   :  { %1561 = vmatprep.subr.bf16.mxu1 %v304_v53 }
  0x73   :  { %1533 = vmatpush3.bf16.msra.mxu0 %v304_v53 }
  0x74   :  { %1569 = vmatpush3.bf16.msra.mxu1 %v304_v53  ;;  %1534 = vmatprep.subr.bf16.mxu0 %v303_v56 }
  0x75   :  { %919 = vmatmul.mubr.bf16.gmra.mxu0 %v1638_v57  ;;  %1562 = vmatprep.subr.bf16.mxu1 %v303_v56 }
  0x76   :  { %1016 = vmatmul.mubr.bf16.gmra.mxu1 %v1639_v60  ;;  %926 = vmatprep.mubr.bf16.mxu0 %v1640_v61 }
  0x77   :  { %1023 = vmatprep.mubr.bf16.mxu1 %v1642_v62  ;;  %1535 = vmatpush3.bf16.msra.mxu0 %v303_v56 }
  0x78   :  { %1570 = vmatpush3.bf16.msra.mxu1 %v303_v56  ;;  %1536 = vmatprep.subr.bf16.mxu0 %v302_v63 }
  0x79   :  { %1563 = vmatprep.subr.bf16.mxu1 %v302_v63 }
  0x7b   :  { %1537 = vmatpush3.bf16.msra.mxu0 %v302_v63 }
  0x7c   :  { %1571 = vmatpush3.bf16.msra.mxu1 %v302_v63  ;;  %1538 = vmatprep.subr.bf16.mxu0 %v301_v2 }
  0x7d   :  { %927 = vmatmul.mubr.bf16.gmra.mxu0 %v1644_v3  ;;  %1564 = vmatprep.subr.bf16.mxu1 %v301_v2 }
  0x7e   :  { %1024 = vmatmul.mubr.bf16.gmra.mxu1 %v1645_v6  ;;  %934 = vmatprep.mubr.bf16.mxu0 %v1646_v7 }
  0x7f   :  { %1031 = vmatprep.mubr.bf16.mxu1 %v1648_v8  ;;  %1539 = vmatpush3.bf16.msra.mxu0 %v301_v2 }
  0x80   :  { %1572 = vmatpush3.bf16.msra.mxu1 %v301_v2  ;;  %1540 = vmatprep.subr.bf16.mxu0 %v300_v9 }
  0x81   :  { %1565 = vmatprep.subr.bf16.mxu1 %v300_v9 }
  0x83   :  { %1541 = vmatpush3.bf16.msra.mxu0 %v300_v9 }
  0x84   :  { %1573 = vmatpush3.bf16.msra.mxu1 %v300_v9 }
  0x85   :  { %935 = vmatmul.mubr.bf16.gmra.mxu0 %v1650_v10 }
  0x86   :  { %1032 = vmatmul.mubr.bf16.gmra.mxu1 %v1651_v11  ;;  %942 = vmatprep.mubr.bf16.mxu0 %v1652_v12 }
  0x87   :  { %1039 = vmatprep.mubr.bf16.mxu1 %v1654_v13 }
  0x8d   :  { %943 = vmatmul.mubr.bf16.gmra.mxu0 %v1656_v14 }
  0x8e   :  { %1040 = vmatmul.mubr.bf16.gmra.mxu1 %v1657_v15  ;;  %950 = vmatprep.mubr.bf16.mxu0 %v1658_v16 }
  0x8f   :  { %1047 = vmatprep.mubr.bf16.mxu1 %v1660_v17 }
  0x95   :  { %951 = vmatmul.mubr.bf16.gmra.mxu0 %v1662_v18 }
  0x96   :  { %1048 = vmatmul.mubr.bf16.gmra.mxu1 %v1663_v19  ;;  %958 = vmatprep.mubr.bf16.mxu0 %v1664_v20 }
  0x97   :  { %1055 = vmatprep.mubr.bf16.mxu1 %v1666_v21 }
  0x9d   :  { %959 = vmatmul.mubr.bf16.gmra.mxu0 %v1668_v22 }
  0x9e   :  { %1056 = vmatmul.mubr.bf16.gmra.mxu1 %v1669_v23  ;;  %1542 = vmatprep.mubr.bf16.mxu0 %v1670_v24 }
  0x9f   :  { %1550 = vmatprep.mubr.bf16.mxu1 %v1671_v25 }
  0xa5   :  { %1543 = vmatmul.mubr.bf16.vlgmr.msra.gmra.mxu0 %v1672_v26 }
  0xa6   :  { %1551 = vmatmul.mubr.bf16.vlgmr.msra.gmra.mxu1 %v1673_v27  ;;  %1546 = vmatprep.mubr.bf16.mxu0 %v1674_v28 }
  0xa7   :  { %1554 = vmatprep.mubr.bf16.mxu1 %v1675_v29 }
  0xad   :  { %1547 = vmatmul.mubr.bf16.gmra.mxu0 %v1676_v30 }
  0xae   :  { %1555 = vmatmul.mubr.bf16.gmra.mxu1 %v1677_v31 }
  0xe5   :  { %v1270_v32 = vpop.f32.mrf.mxu0 }
  0xe6   :  { %v1334_v33 = vpop.f32.mrf.mxu1 }
  0xe7   :  { %v1271_v34 = vpop.f32.mrf.mxu0 }
  0xe8   :  { %v1272_v35 = vadd.f32 %v1271_v34, %v1270_v32  ;;  %v1335_v36 = vpop.f32.mrf.mxu1 }
  0xe9   :  { %v1336_v37 = vadd.f32 %v1335_v36, %v1334_v33  ;;  %v1273_v38 = vpop.f32.mrf.mxu0 }
  0xea   :  { %v1337_v39 = vpop.f32.mrf.mxu1 }
  0xeb   :  { %v2341_v40 = vadd.f32 %v1336_v37, %v1272_v35  ;;  %v1274_v41 = vpop.f32.mrf.mxu0 }
  0xec   :  { %v1275_v42 = vadd.f32 %v1274_v41, %v1273_v38  ;;  %v1338_v43 = vpop.f32.mrf.mxu1 }
  0xed   :  { %v1339_v44 = vadd.f32 %v1338_v43, %v1337_v39  ;;  %v1276_v45 = vpop.f32.mrf.mxu0 }
  0xee   :  { %v1340_v46 = vpop.f32.mrf.mxu1 }
  0xef   :  { %v2343_v47 = vadd.f32 %v1339_v44, %v1275_v42  ;;  %v1277_v48 = vpop.f32.mrf.mxu0 }
  0xf0   :  { %v1278_v49 = vadd.f32 %v1277_v48, %v1276_v45  ;;  %v1341_v50 = vpop.f32.mrf.mxu1 }
  0xf1   :  { %v1342_v51 = vadd.f32 %v1341_v50, %v1340_v46  ;;  %v1279_v52 = vpop.f32.mrf.mxu0 }
  0xf2   :  { %v1343_v53 = vpop.f32.mrf.mxu1 }
  0xf3   :  { %v2345_v54 = vadd.f32 %v1342_v51, %v1278_v49  ;;  %v1280_v55 = vpop.f32.mrf.mxu0 }
  0xf4   :  { %v1281_v56 = vadd.f32 %v1280_v55, %v1279_v52  ;;  %v1344_v57 = vpop.f32.mrf.mxu1 }
  0xf5   :  { %v1345_v58 = vadd.f32 %v1344_v57, %v1343_v53  ;;  %v1282_v59 = vpop.f32.mrf.mxu0 }
  0xf6   :  { %v1346_v60 = vpop.f32.mrf.mxu1 }
  0xf7   :  { %v2347_v61 = vadd.f32 %v1345_v58, %v1281_v56  ;;  %v1283_v62 = vpop.f32.mrf.mxu0 }
  0xf8   :  { %v1284_v63 = vadd.f32 %v1283_v62, %v1282_v59  ;;  %v1347_v0 = vpop.f32.mrf.mxu1 }
  0xf9   :  { %v1348_v1 = vadd.f32 %v1347_v0, %v1346_v60  ;;  %v1285_v2 = vpop.f32.mrf.mxu0 }
  0xfa   :  { %v1349_v3 = vpop.f32.mrf.mxu1 }
  0xfb   :  { %v2349_v4 = vadd.f32 %v1348_v1, %v1284_v63  ;;  %v1286_v5 = vpop.f32.mrf.mxu0 }
  0xfc   :  { %v1287_v6 = vadd.f32 %v1286_v5, %v1285_v2  ;;  %v1350_v7 = vpop.f32.mrf.mxu1 }
  0xfd   :  { %v1351_v8 = vadd.f32 %v1350_v7, %v1349_v3  ;;  %v1288_v9 = vpop.f32.mrf.mxu0 }
  0xfe   :  { %v1352_v10 = vpop.f32.mrf.mxu1 }
  0xff   :  { %v2351_v11 = vadd.f32 %v1351_v8, %v1287_v6  ;;  %v1289_v12 = vpop.f32.mrf.mxu0 }
 0x100   :  { %v1290_v13 = vadd.f32 %v1289_v12, %v1288_v9  ;;  %v1353_v14 = vpop.f32.mrf.mxu1 }
 0x101   :  { %2546 = vst [vmem:[#allocation2_spill] sm:$0xff] %v2351_v11  ;;  %v1354_v15 = vadd.f32 %v1353_v14, %v1352_v10  ;;  %v1291_v16 = vpop.f32.mrf.mxu0 }
 0x102   :  { %v1355_v17 = vpop.f32.mrf.mxu1 }
 0x103   :  { %v2353_v18 = vadd.f32 %v1354_v15, %v1290_v13  ;;  %v1292_v19 = vpop.f32.mrf.mxu0 }
 0x104   :  { %v1293_v20 = vadd.f32 %v1292_v19, %v1291_v16  ;;  %v1356_v21 = vpop.f32.mrf.mxu1 }
 0x105   :  { %v1357_v22 = vadd.f32 %v1356_v21, %v1355_v17  ;;  %v1294_v23 = vpop.f32.mrf.mxu0 }
 0x106   :  { %v1358_v24 = vpop.f32.mrf.mxu1 }
 0x107   :  { %v2355_v25 = vadd.f32 %v1357_v22, %v1293_v20  ;;  %v1295_v26 = vpop.f32.mrf.mxu0 }
 0x108   :  { %v1296_v27 = vadd.f32 %v1295_v26, %v1294_v23  ;;  %v1359_v28 = vpop.f32.mrf.mxu1 }
 0x109   :  { %2547 = vst [vmem:[#allocation3_spill] sm:$0xff] %v2355_v25  ;;  %v1360_v29 = vadd.f32 %v1359_v28, %v1358_v24  ;;  %v1297_v30 = vpop.f32.mrf.mxu0 }
 0x10a   :  { %v1361_v31 = vpop.f32.mrf.mxu1 }
 0x10b   :  { %v2357_v32 = vadd.f32 %v1360_v29, %v1296_v27  ;;  %v1298_v33 = vpop.f32.mrf.mxu0 }
 0x10c   :  { %v1299_v34 = vadd.f32 %v1298_v33, %v1297_v30  ;;  %v1362_v35 = vpop.f32.mrf.mxu1 }
 0x10d   :  { %v1363_v36 = vadd.f32 %v1362_v35, %v1361_v31  ;;  %v1300_v37 = vpop.f32.mrf.mxu0 }
 0x10e   :  { %v1364_v38 = vpop.f32.mrf.mxu1 }
 0x10f   :  { %v2359_v39 = vadd.f32 %v1363_v36, %v1299_v34  ;;  %v1301_v41 = vpop.f32.mrf.mxu0 }
 0x110   :  { %v1302_v42 = vadd.f32 %v1301_v41, %v1300_v37  ;;  %v1365_v43 = vpop.f32.mrf.mxu1 }
 0x111   :  { %v1366_v44 = vadd.f32 %v1365_v43, %v1364_v38  ;;  %v1303_v45 = vpop.f32.mrf.mxu0 }
 0x112   :  { %v1367_v46 = vpop.f32.mrf.mxu1 }
 0x113   :  { %v2361_v48 = vadd.f32 %v1366_v44, %v1302_v42  ;;  %v1304_v49 = vpop.f32.mrf.mxu0 }
 0x114   :  { %v1305_v50 = vadd.f32 %v1304_v49, %v1303_v45  ;;  %v1368_v51 = vpop.f32.mrf.mxu1 }
 0x115   :  { %v1369_v52 = vadd.f32 %v1368_v51, %v1367_v46  ;;  %v1306_v53 = vpop.f32.mrf.mxu0 }
 0x116   :  { %v1370_v55 = vpop.f32.mrf.mxu1 }
 0x117   :  { %v2363_v56 = vadd.f32 %v1369_v52, %v1305_v50  ;;  %v1307_v57 = vpop.f32.mrf.mxu0 }
 0x118   :  { %v1308_v58 = vadd.f32 %v1307_v57, %v1306_v53  ;;  %v1371_v59 = vpop.f32.mrf.mxu1 }
 0x119   :  { %v1372_v60 = vadd.f32 %v1371_v59, %v1370_v55  ;;  %v1309_v62 = vpop.f32.mrf.mxu0 }
 0x11a   :  { %v1373_v63 = vpop.f32.mrf.mxu1 }
 0x11b   :  { %v2365_v0 = vadd.f32 %v1372_v60, %v1308_v58  ;;  %v1310_v1 = vpop.f32.mrf.mxu0 }
 0x11c   :  { %v1311_v2 = vadd.f32 %v1310_v1, %v1309_v62  ;;  %v1374_v3 = vpop.f32.mrf.mxu1 }
 0x11d   :  { %2548 = vst [vmem:[#allocation4_spill] sm:$0xff] %v2365_v0  ;;  %v1375_v5 = vadd.f32 %v1374_v3, %v1373_v63  ;;  %v1312_v6 = vpop.f32.mrf.mxu0 }
 0x11e   :  { %v1376_v7 = vpop.f32.mrf.mxu1 }
 0x11f   :  { %v2367_v8 = vadd.f32 %v1375_v5, %v1311_v2  ;;  %v1313_v9 = vpop.f32.mrf.mxu0 }
 0x120   :  { %v1314_v10 = vadd.f32 %v1313_v9, %v1312_v6  ;;  %v1377_v12 = vpop.f32.mrf.mxu1 }
 0x121   :  { %2549 = vst [vmem:[#allocation5_spill] sm:$0xff] %v2367_v8  ;;  %v1378_v13 = vadd.f32 %v1377_v12, %v1376_v7  ;;  %v1315_v14 = vpop.f32.mrf.mxu0 }
 0x122   :  { %v1379_v15 = vpop.f32.mrf.mxu1 }
 0x123   :  { %v2369_v16 = vadd.f32 %v1378_v13, %v1314_v10  ;;  %v1316_v17 = vpop.f32.mrf.mxu0 }
 0x124   :  { %v1317_v19 = vadd.f32 %v1316_v17, %v1315_v14  ;;  %v1380_v20 = vpop.f32.mrf.mxu1 }
 0x125   :  { %2550 = vst [vmem:[#allocation6_spill] sm:$0xff] %v2369_v16  ;;  %v1381_v21 = vadd.f32 %v1380_v20, %v1379_v15  ;;  %v1398_v22 = vpop.f32.mrf.mxu0 }
 0x126   :  { %v2371_v23 = vpop.f32.mrf.mxu1 }
 0x127   :  { %v2373_v24 = vadd.f32 %v1381_v21, %v1317_v19  ;;  %v1399_v26 = vpop.f32.mrf.mxu0 }
 0x128   :  { %v2375_v27 = vpop.f32.mrf.mxu1 }
 0x129   :  { %2551 = vst [vmem:[#allocation7_spill] sm:$0xff] %v2373_v24  ;;  %v1401_v28 = vpop.f32.mrf.mxu0  ;;  %v1400_v24 = vadd.f32 %v1399_v26, %v1398_v22  ;;  %v1464_v26 = vadd.f32 %v2375_v27, %v2371_v23 }
 0x12a   :  { %v2377_v29 = vpop.f32.mrf.mxu1 }
 0x12b   :  { %v1402_v30 = vpop.f32.mrf.mxu0 }
 0x12c   :  { %v2379_v31 = vpop.f32.mrf.mxu1 }
 0x12d   :  { %v1404_v33 = vpop.f32.mrf.mxu0 }
 0x12e   :  { %v2381_v34 = vpop.f32.mrf.mxu1 }
 0x12f   :  { %v1405_v35 = vpop.f32.mrf.mxu0 }
 0x130   :  { %v2383_v36 = vpop.f32.mrf.mxu1 }
 0x131   :  { %v1407_v37 = vpop.f32.mrf.mxu0 }
 0x132   :  { %v2385_v38 = vpop.f32.mrf.mxu1 }
 0x133   :  { %v1408_v41 = vpop.f32.mrf.mxu0 }
 0x134   :  { %v2387_v42 = vpop.f32.mrf.mxu1 }
 0x135   :  { %v1410_v43 = vpop.f32.mrf.mxu0 }
 0x136   :  { %v2389_v44 = vpop.f32.mrf.mxu1 }
 0x137   :  { %2552 = vst [vmem:[#allocation8_spill] sm:$0xff] %v2389_v44  ;;  %v1411_v45 = vpop.f32.mrf.mxu0  ;;  %v1406_v44 = vadd.f32 %v1405_v35, %v1404_v33 }
 0x138   :  { %v2391_v46 = vpop.f32.mrf.mxu1 }
 0x139   :  { %2553 = vst [vmem:[#allocation9_spill] sm:$0xff] %v2391_v46  ;;  %v2393_v49 = vpop.f32.mrf.mxu0  ;;  %v1403_v46 = vadd.f32 %v1402_v30, %v1401_v28  ;;  %v1467_v28 = vadd.f32 %v2379_v31, %v2377_v29 }
 0x13a   :  { %2554 = vst [vmem:[#allocation10_spill] sm:$0xff] %v2393_v49  ;;  %v2395_v50 = vpop.f32.mrf.mxu1 }
 0x13b   :  { %2555 = vst [vmem:[#allocation11_spill] sm:$0xff] %v2395_v50  ;;  %v2397_v51 = vpop.f32.mrf.mxu0 }
 0x13c   :  { %2556 = vst [vmem:[#allocation12_spill] sm:$0xff] %v2397_v51  ;;  %v2399_v52 = vpop.f32.mrf.mxu1  ;;  %v1409_v51 = vadd.f32 %v1408_v41, %v1407_v37  ;;  %v1412_v37 = vadd.f32 %v1411_v45, %v1410_v43 }
 0x13d   :  { %2557 = vst [vmem:[#allocation13_spill] sm:$0xff] %v2399_v52  ;;  %v1416_v53 = vpop.f32.mrf.mxu0 }
 0x13e   :  { %v2401_v55 = vpop.f32.mrf.mxu1 }
 0x13f   :  { %2558 = vst [vmem:[#allocation14_spill] sm:$0xff] %v2401_v55  ;;  %v1417_v57 = vpop.f32.mrf.mxu0 }
 0x140   :  { %v2403_v58 = vpop.f32.mrf.mxu1  ;;  %v1418_v29 = vadd.f32 %v1417_v57, %v1416_v53  ;;  %v2566_v57 = vld [vmem:[#allocation6_spill] sm:$0xff] }
 0x141   :  { %2559 = vst [vmem:[#allocation15_spill] sm:$0xff] %v2403_v58  ;;  %v2405_v59 = vpop.f32.mrf.mxu0 }
 0x142   :  { %v2407_v60 = vpop.f32.mrf.mxu1 }
 0x143   :  { %2560 = vst [vmem:[#allocation16_spill] sm:$0xff] %v2407_v60  ;;  %v2409_v62 = vpop.f32.mrf.mxu0 }
 0x144   :  { %v2411_v63 = vpop.f32.mrf.mxu1 }
 0x145   :  { %2561 = vst [vmem:[#allocation17_spill] sm:$0xff] %v2411_v63  ;;  %v1422_v1 = vpop.f32.mrf.mxu0 }
 0x146   :  { %v1486_v2 = vpop.f32.mrf.mxu1 }
 0x147   :  { %v1423_v3 = vpop.f32.mrf.mxu0 }
 0x148   :  { %v1487_v5 = vpop.f32.mrf.mxu1  ;;  %v1424_v16 = vadd.f32 %v1423_v3, %v1422_v1 }
 0x149   :  { %v1425_v6 = vpop.f32.mrf.mxu0 }
 0x14a   :  { %v2413_v7 = vpop.f32.mrf.mxu1 }
 0x14b   :  { %v1426_v9 = vpop.f32.mrf.mxu0 }
 0x14c   :  { %v2415_v10 = vpop.f32.mrf.mxu1 }
 0x14d   :  { %v1428_v12 = vpop.f32.mrf.mxu0 }
 0x14e   :  { %v1492_v13 = vpop.f32.mrf.mxu1 }
 0x14f   :  { %v1429_v14 = vpop.f32.mrf.mxu0 }
 0x150   :  { %v1493_v15 = vpop.f32.mrf.mxu1  ;;  %v1430_v58 = vadd.f32 %v1429_v14, %v1428_v12  ;;  %v2571_v14 = vld [vmem:[#allocation4_spill] sm:$0xff] }
 0x151   :  { %v1431_v17 = vpop.f32.mrf.mxu0 }
 0x152   :  { %v1495_v19 = vpop.f32.mrf.mxu1  ;;  %v945_v30 = vadd.f32 %v1430_v58, %v2361_v48  ;;  %v1473_v48 = vadd.f32 %v2387_v42, %v2385_v38 }
 0x153   :  { %v1432_v20 = vpop.f32.mrf.mxu0 }
 0x154   :  { %v1496_v21 = vpop.f32.mrf.mxu1  ;;  %v1433_v33 = vadd.f32 %v1432_v20, %v1431_v17 }
 0x155   :  { %v1434_v52 = vpop.f32.mrf.mxu0  ;;  %v1497_v3 = vadd.f32 %v1496_v21, %v1495_v19 }
 0x156   :  { %v2417_v50 = vpop.f32.mrf.mxu1 }
 0x157   :  { %2562 = vst [vmem:[#allocation18_spill] sm:$0xff] %v2417_v50  ;;  %v1435_v8 = vpop.f32.mrf.mxu0  ;;  %v905_v50 = vadd.f32 %v1400_v24, %v2341_v40  ;;  %v1470_v40 = vadd.f32 %v2383_v36, %v2381_v34  ;;  %v916_v24 = vadd.f32 %v1409_v51, %v2347_v61  ;;  %v1488_v34 = vadd.f32 %v1487_v5, %v1486_v2  ;;  %v2569_v5 = vld [vmem:[#allocation14_spill] sm:$0xff] }
 0x158   :  { %v2419_v63 = vpop.f32.mrf.mxu1  ;;  %v948_v61 = vadd.f32 %v1433_v33, %v2363_v56  ;;  %v921_v51 = vadd.f32 %v1412_v37, %v2349_v4  ;;  %v1421_v56 = vadd.f32 %v2409_v62, %v2405_v59  ;;  %v2567_v62 = vld [vmem:[#allocation10_spill] sm:$0xff] }
 0x159   :  { %2563 = vst [vmem:[#allocation19_spill] sm:$0xff] %v2419_v63  ;;  %v2421_v60 = vpop.f32.mrf.mxu0  ;;  %v1002_v27 = vadd.f32 %v1464_v26, %v905_v50  ;;  %v1013_v50 = vadd.f32 %v1473_v48, %v916_v24 }
 0x15a   :  { %2564 = vst [vmem:[#allocation20_spill] sm:$0xff] %v2421_v60  ;;  %v2423_v11 = vpop.f32.mrf.mxu1  ;;  %v908_v60 = vadd.f32 %v1403_v46, %v2343_v47  ;;  %v1427_v47 = vadd.f32 %v1426_v9, %v1425_v6  ;;  %v1436_v6 = vadd.f32 %v1435_v8, %v1434_v52 }
 0x15b   :  { %2565 = vst [vmem:[#allocation21_spill] sm:$0xff] %v2423_v11  ;;  %v2425_v25 = vpop.f32.mrf.mxu0  ;;  %v913_v11 = vadd.f32 %v1406_v44, %v2345_v54  ;;  %v937_v54 = vadd.f32 %v1424_v16, %v2357_v32  ;;  %v1494_v44 = vadd.f32 %v1493_v15, %v1492_v13 }
 0x15c   :  { %v2427_v0 = vpop.f32.mrf.mxu1  ;;  %v1005_v58 = vadd.f32 %v1467_v28, %v908_v60  ;;  %v940_v32 = vadd.f32 %v1427_v47, %v2359_v39  ;;  %v1045_v60 = vadd.f32 %v1497_v3, %v948_v61  ;;  %v953_v15 = vadd.f32 %v1436_v6, %v2571_v14  ;;  %v2573_v28 = vld [vmem:[#allocation8_spill] sm:$0xff]  ;;  %v2581_v61 = vld [vmem:[#allocation17_spill] sm:$0xff] }
 0x15d   :  { %v1440_v55 = vpop.f32.mrf.mxu0  ;;  %v1010_v46 = vadd.f32 %v1470_v40, %v913_v11  ;;  %v1042_v45 = vadd.f32 %v1494_v44, %v945_v30  ;;  %v1034_v53 = vadd.f32 %v1488_v34, %v937_v54  ;;  %v929_v11 = vadd.f32 %v1418_v29, %v2353_v18  ;;  %v2574_v30 = vld [vmem:[#allocation9_spill] sm:$0xff]  ;;  %v2578_v54 = vld [vmem:[#allocation7_spill] sm:$0xff]  ;;  %v2579_v29 = vld [vmem:[#allocation2_spill] sm:$0xff] }
 0x15e   :  { %v2429_v49 = vpop.f32.mrf.mxu1  ;;  %v1476_v33 = vadd.f32 %v2574_v30, %v2573_v28  ;;  %v2580_v34 = vld [vmem:[#allocation16_spill] sm:$0xff] }
 0x15f   :  { %v1441_v63 = vpop.f32.mrf.mxu0 }
 0x160   :  { %v1505_v22 = vpop.f32.mrf.mxu1  ;;  %v1442_v36 = vadd.f32 %v1441_v63, %v1440_v55  ;;  %v1491_v55 = vadd.f32 %v2415_v10, %v2413_v7  ;;  %v2568_v63 = vld [vmem:[#allocation12_spill] sm:$0xff]  ;;  %v2570_v7 = vld [vmem:[#allocation15_spill] sm:$0xff] }
 0x161   :  { %v1443_v35 = vpop.f32.mrf.mxu0  ;;  %v1415_v2 = vadd.f32 %v2568_v63, %v2567_v62  ;;  %v1482_v9 = vadd.f32 %v2570_v7, %v2569_v5  ;;  %v2572_v17 = vld [vmem:[#allocation20_spill] sm:$0xff]  ;;  %v1506_v20 = vadd.f32 %v1505_v22, %v2429_v49  ;;  %v2576_v22 = vld [vmem:[#allocation18_spill] sm:$0xff]  ;;  %v2577_v37 = vld [vmem:[#allocation19_spill] sm:$0xff] }
 0x162   :  { %v2442_v41 = vpop.f32.mrf.mxu1  ;;  %v961_v8 = vadd.f32 %v1442_v36, %v2566_v57  ;;  %v1037_v13 = vadd.f32 %v1491_v55, %v940_v32  ;;  %v1439_v19 = vadd.f32 %v2425_v25, %v2572_v17  ;;  %v1500_v47 = vadd.f32 %v2577_v37, %v2576_v22  ;;  %v2582_v32 = vld [vmem:[#allocation5_spill] sm:$0xff] }
 0x163   :  { %v1444_v23 = vpop.f32.mrf.mxu0  ;;  %v1026_v49 = vadd.f32 %v1482_v9, %v929_v11 }
 0x164   :  { %v1508_v31 = vpop.f32.mrf.mxu1  ;;  %v1445_v52 = vadd.f32 %v1444_v23, %v1443_v35  ;;  %v2575_v35 = vld [vmem:[#allocation3_spill] sm:$0xff]  ;;  %v1058_v48 = vadd.f32 %v1506_v20, %v961_v8  ;;  %v1050_v6 = vadd.f32 %v1500_v47, %v953_v15 }
 0x165   :  { %v1544_v43 = vpop.f32.mrf.mxu0  ;;  %v932_v40 = vadd.f32 %v1421_v56, %v2575_v35 }
 0x166   :  { %v1107_v16 = vadd.f32 %v1544_v43, %v1010_v46  ;;  %v1552_v1 = vpop.f32.mrf.mxu1  ;;  %v964_v44 = vadd.f32 %v1445_v52, %v2578_v54  ;;  %v924_v46 = vadd.f32 %v1415_v2, %v2579_v29 }
 0x167   :  { %v1139_v38 = vadd.f32 %v1552_v1, %v1042_v45  ;;  %v1098_v42 = vpop.f32.mrf.mxu0  ;;  %v1018_v45 = vadd.f32 %v1476_v33, %v921_v51  ;;  %v1509_v1 = vadd.f32 %v1508_v31, %v2442_v41  ;;  %v2585_v41 = vld [vmem:[#allocation21_spill] sm:$0xff] }
 0x168   :  { %1164 = vst.msk [vmem:[%s2545_s2 + $0x10] sm:$0xff] %vm1161_vm0, %v1107_v16  ;;  %v1099_v4 = vadd.f32 %v1098_v42, %v1002_v27  ;;  %v1130_v39 = vpop.f32.mrf.mxu1  ;;  %v956_v16 = vadd.f32 %v1439_v19, %v2582_v32  ;;  %v2584_v42 = vld [vmem:[#allocation13_spill] sm:$0xff]  ;;  %v1503_v31 = vadd.f32 %v2427_v0, %v2585_v41 }
 0x169   :  { %1172 = vst.msk [vmem:[%s2545_s2 + $0x50] sm:$0xff] %vm1161_vm0, %v1139_v38  ;;  %v1131_v18 = vadd.f32 %v1130_v39, %v1034_v53  ;;  %v1545_v59 = vpop.f32.mrf.mxu0  ;;  %v2583_v38 = vld [vmem:[#allocation11_spill] sm:$0xff]  ;;  %v1061_v39 = vadd.f32 %v1509_v1, %v964_v44 }
 0x16a   :  { %1162 = vst.msk [vmem:[%s2545_s2] sm:$0xff] %vm1161_vm0, %v1099_v4  ;;  %v1110_v10 = vadd.f32 %v1545_v59, %v1013_v50  ;;  %v1553_v12 = vpop.f32.mrf.mxu1  ;;  %v1479_v53 = vadd.f32 %v2584_v42, %v2583_v38  ;;  %v1053_v59 = vadd.f32 %v1503_v31, %v956_v16 }
 0x16b   :  { %1170 = vst.msk [vmem:[%s2545_s2 + $0x40] sm:$0xff] %vm1161_vm0, %v1131_v18  ;;  %v1142_v21 = vadd.f32 %v1553_v12, %v1045_v60  ;;  %v1101_v26 = vpop.f32.mrf.mxu0 }
 0x16c   :  { %1165 = vst.msk [vmem:[%s2545_s2 + $0x18] sm:$0xff] %vm1161_vm0, %v1110_v10  ;;  %v1102_v25 = vadd.f32 %v1101_v26, %v1005_v58  ;;  %v1133_v24 = vpop.f32.mrf.mxu1  ;;  %v1485_v58 = vadd.f32 %v2581_v61, %v2580_v34  ;;  %v1021_v52 = vadd.f32 %v1479_v53, %v924_v46 }
 0x16d   :  { %1173 = vst.msk [vmem:[%s2545_s2 + $0x58] sm:$0xff] %vm1161_vm0, %v1142_v21  ;;  %v1134_v23 = vadd.f32 %v1133_v24, %v1037_v13  ;;  %v1548_v27 = vpop.f32.mrf.mxu0 }
 0x16e   :  { %1163 = vst.msk [vmem:[%s2545_s2 + $0x8] sm:$0xff] %vm1161_vm0, %v1102_v25  ;;  %v1123_v36 = vadd.f32 %v1548_v27, %v1026_v49  ;;  %v1556_v43 = vpop.f32.mrf.mxu1  ;;  %v1029_v56 = vadd.f32 %v1485_v58, %v932_v40 }
 0x16f   :  { %1171 = vst.msk [vmem:[%s2545_s2 + $0x48] sm:$0xff] %vm1161_vm0, %v1134_v23  ;;  %v1155_v50 = vadd.f32 %v1556_v43, %v1058_v48  ;;  %v1114_v3 = vpop.f32.mrf.mxu0 }
 0x170   :  { %1168 = vst.msk [vmem:[%s2545_s2 + $0x30] sm:$0xff] %vm1161_vm0, %v1123_v36  ;;  %v1115_v51 = vadd.f32 %v1114_v3, %v1018_v45  ;;  %v1146_v11 = vpop.f32.mrf.mxu1 }
 0x171   :  { %1176 = vst.msk [vmem:[%s2545_s2 + $0x70] sm:$0xff] %vm1161_vm0, %v1155_v50  ;;  %v1147_v55 = vadd.f32 %v1146_v11, %v1050_v6  ;;  %v1549_v4 = vpop.f32.mrf.mxu0 }
 0x172   :  { %1166 = vst.msk [vmem:[%s2545_s2 + $0x20] sm:$0xff] %vm1161_vm0, %v1115_v51  ;;  %v1126_v57 = vadd.f32 %v1549_v4, %v1029_v56  ;;  %v1557_v8 = vpop.f32.mrf.mxu1 }
 0x173   :  { %1174 = vst.msk [vmem:[%s2545_s2 + $0x60] sm:$0xff] %vm1161_vm0, %v1147_v55  ;;  %v1158_v0 = vadd.f32 %v1557_v8, %v1061_v39  ;;  %v1117_v18 = vpop.f32.mrf.mxu0 }
 0x174   :  { %1169 = vst.msk [vmem:[%s2545_s2 + $0x38] sm:$0xff] %vm1161_vm0, %v1126_v57  ;;  %v1118_v60 = vadd.f32 %v1117_v18, %v1021_v52  ;;  %v1149_v62 = vpop.f32.mrf.mxu1 }
 0x175   :  { %1177 = vst.msk [vmem:[%s2545_s2 + $0x78] sm:$0xff] %vm1161_vm0, %v1158_v0  ;;  %v1150_v63 = vadd.f32 %v1149_v62, %v1053_v59 }
 0x176   :  { %1167 = vst.msk [vmem:[%s2545_s2 + $0x28] sm:$0xff] %vm1161_vm0, %v1118_v60 }
 0x177   :  { %1175 = vst.msk [vmem:[%s2545_s2 + $0x68] sm:$0xff] %vm1161_vm0, %v1150_v63 }

</bundles_post_ra>
